<compile_context>
chip_gen: v6e
topology: v6e:2x2x1
jax: 0.10.0
libtpu: 0.0.40
codegen_flags: <defaults>
</compile_context>

<pallas_src>
import functools

import jax
import jax.numpy as jnp
from jax.experimental import pallas as pl
from jax.experimental.pallas import tpu as pltpu


def _round_up(x, m):
    return ((x + m - 1) // m) * m


def _device_kind():
    try:
        return jax.devices()[0].device_kind.lower()
    except Exception:
        return ""


def _vmem_capacity_bytes():
    try:
        return int(pltpu.get_tpu_info().vmem_capacity_bytes)
    except Exception:
        return 64 * 1024 * 1024          # conservative (v7x-sized) fallback


def _num_tensorcores():
    kind = _device_kind()
    # Only megacore / 2-TC parts benefit from the "parallel" slice split.
    return 2 if any(tag in kind for tag in ("v7", "7x", "v4", "v5p")) else 1


def _supports_bf16_compute():
    kind = _device_kind()
    # bf16 VPU/EUP exists on v6e and v7x; keep f32 everywhere else (incl. v5e).
    return ("v6" in kind) or ("v7" in kind) or ("7x" in kind)


def _deepmoe_loss_kernel(out_logits_ref, emb_logits_ref, tgt_ref, gates_ref,
                         ce_base_ref, ce_emb_ref, colsum_ref,
                         *, batch_size, tile_b, blocks_per_slice, has_pad,
                         logit_dtype, gate_dtype):
    s = pl.program_id(0)                      # parallel batch slice
    t = pl.program_id(1)                      # reduction (batch-tile) axis

    # Output blocks are resident across the "arbitrary" t axis -> accumulators.
    @pl.when(t == 0)
    def _init():
        ce_base_ref[...] = jnp.zeros_like(ce_base_ref)
        ce_emb_ref[...] = jnp.zeros_like(ce_emb_ref)
        colsum_ref[...] = jnp.zeros_like(colsum_ref)

    tgt = tgt_ref[...]                                        # (TILE_B, 1) int32

    # Padded-row mask: only generated when a padded tail exists (static flag).
    if has_pad:
        row_start = (s * blocks_per_slice + t) * tile_b
        row_idx = jax.lax.broadcasted_iota(jnp.int32, (tile_b, 1), 0) + row_start
        valid = row_idx < batch_size                          # (TILE_B, 1)
    else:
        valid = None

    # Shared predicated target pick (no one-hot); hoisted out of ce_sum so the
    # iota + compare is done once per tile and reused for both logit tensors.
    n_cls = out_logits_ref.shape[-1]
    n_cls_e = emb_logits_ref.shape[-1]
    cls_idx = jax.lax.broadcasted_iota(jnp.int32, (tile_b, n_cls), 1)
    hit = cls_idx == tgt
    if n_cls_e == n_cls:
        hit_e = hit
    else:
        hit_e = jax.lax.broadcasted_iota(jnp.int32, (tile_b, n_cls_e), 1) == tgt

    def ce_sum(lg, hit_mask):
        # sum over rows of (logsumexp - target_logit); accumulations in f32.
        m = jnp.max(lg, axis=-1, keepdims=True)
        e = jnp.exp(lg - m)
        lse = m.astype(jnp.float32) + jnp.log(
            jnp.sum(e, axis=-1, keepdims=True, dtype=jnp.float32))
        tgt_logit = jnp.sum(jnp.where(hit_mask, lg, 0.0),
                            axis=-1, keepdims=True, dtype=jnp.float32)
        per_row = lse - tgt_logit                              # (TILE_B, 1) f32
        if valid is not None:
            per_row = jnp.where(valid, per_row, 0.0)
        return jnp.sum(per_row)                                # scalar f32

    logits = out_logits_ref[...].astype(logit_dtype)           # (TILE_B, C)
    emb_logits = emb_logits_ref[...].astype(logit_dtype)       # (TILE_B, Ce)

    ce_base_ref[...] += ce_sum(logits, hit)                    # (1, 1, 1)
    ce_emb_ref[...] += ce_sum(emb_logits, hit_e)               # (1, 1, 1)

    # Per-column |gate| sums over this batch tile (lane-dense, GE % 128 == 0).
    g = gates_ref[...].astype(gate_dtype)                      # (TILE_B, GE_pad)
    colsum_ref[...] += jnp.sum(jnp.abs(g), axis=0, keepdims=True,
                               dtype=jnp.float32)[None]        # (1, 1, GE_pad)


def deepmoe_loss(outputs, embedding_outputs, targets, gates,
                 lambda_val=0.001, mu=1.0):
    """Pallas implementation of deepmoe_loss.forward.

    outputs, embedding_outputs: [B, C] float logits
    targets: [B] int class indices
    gates: list of [B, E_i] float gate tensors
    """
    B, C = outputs.shape
    Ce = embedding_outputs.shape[1]

    # Pack gates lane-dense: (B, sum_i E_i), padded up to a multiple of 128
    # with zero columns (zero columns never change column sums; per-gate max
    # slices below use static offsets that never touch the pad).
    gate_widths = [int(g.shape[1]) for g in gates]
    if gates:
        gates_packed = jnp.concatenate(list(gates), axis=-1)
    else:
        gates_packed = jnp.zeros((B, 128), jnp.float32)
    GE = gates_packed.shape[1]
    GE_pad = _round_up(GE, 128)
    if GE_pad != GE:
        gates_packed = jnp.pad(gates_packed, ((0, 0), (0, GE_pad - GE)))

    # --- tile sizing derived from the chip's actual VMEM capacity
    itemsizes = [outputs.dtype.itemsize, embedding_outputs.dtype.itemsize,
                 gates_packed.dtype.itemsize]
    gran = max(32 // i for i in itemsizes)          # 8 for f32, 16 for bf16, ...
    bytes_per_row = (outputs.dtype.itemsize * C
                     + embedding_outputs.dtype.itemsize * Ce
                     + gates_packed.dtype.itemsize * GE_pad + 4)
    vmem_cap = _vmem_capacity_bytes()
    vmem_limit = min((vmem_cap * 3) // 4, 96 * 1024 * 1024)
    budget = vmem_limit // 3                        # per input set (x2 double-buffered)
    tile_b = max(gran, min(2048, (budget // max(bytes_per_row, 1)) // gran * gran))
    tile_b = min(tile_b, _round_up(B, gran))

    num_tiles = -(-B // tile_b)
    num_tc = _num_tensorcores()
    S = 2 if (num_tc >= 2 and num_tiles >= 2) else 1   # slice split only on 2-TC chips
    T = -(-num_tiles // S)
    B_pad = S * T * tile_b

    pad = B_pad - B
    targets_i = targets.astype(jnp.int32)
    if pad:
        outputs = jnp.pad(outputs, ((0, pad), (0, 0)))
        embedding_outputs = jnp.pad(embedding_outputs, ((0, pad), (0, 0)))
        gates_packed = jnp.pad(gates_packed, ((0, pad), (0, 0)))
        targets_i = jnp.pad(targets_i, ((0, pad),))
    tgt2d = targets_i.reshape(B_pad, 1)

    # bf16 arithmetic only when the inputs are already bf16 AND the chip has a
    # bf16 VPU/EUP; accumulations stay f32 inside the kernel either way.
    bf16_ok = _supports_bf16_compute()
    logit_dtype = (jnp.bfloat16
                   if (bf16_ok and outputs.dtype == jnp.bfloat16
                       and embedding_outputs.dtype == jnp.bfloat16)
                   else jnp.float32)
    gate_dtype = (jnp.bfloat16
                  if (bf16_ok and gates_packed.dtype == jnp.bfloat16)
                  else jnp.float32)

    kernel = functools.partial(_deepmoe_loss_kernel,
                               batch_size=int(B), tile_b=int(tile_b),
                               blocks_per_slice=int(T), has_pad=bool(pad),
                               logit_dtype=logit_dtype, gate_dtype=gate_dtype)

    row_map = lambda s, t: (s * T + t, 0)
    slice_map = lambda s, t: (s, 0, 0)

    ce_base, ce_emb, colsum = pl.pallas_call(
        kernel,
        grid=(S, T),
        in_specs=[
            pl.BlockSpec((tile_b, C), row_map),        # outputs
            pl.BlockSpec((tile_b, Ce), row_map),       # embedding_outputs
            pl.BlockSpec((tile_b, 1), row_map),        # targets
            pl.BlockSpec((tile_b, GE_pad), row_map),   # packed gates (lane-dense)
        ],
        out_specs=(
            pl.BlockSpec((1, 1, 1), slice_map),        # CE sum (base), per slice
            pl.BlockSpec((1, 1, 1), slice_map),        # CE sum (embedding), per slice
            pl.BlockSpec((1, 1, GE_pad), slice_map),   # per-column |gate| sums
        ),
        out_shape=(
            jax.ShapeDtypeStruct((S, 1, 1), jnp.float32),
            jax.ShapeDtypeStruct((S, 1, 1), jnp.float32),
            jax.ShapeDtypeStruct((S, 1, GE_pad), jnp.float32),
        ),
        compiler_params=pltpu.CompilerParams(
            dimension_semantics=("parallel", "arbitrary"),
            vmem_limit_bytes=int(vmem_limit),
        ),
    )(outputs, embedding_outputs, tgt2d, gates_packed)

    # Trivial final combine in plain JAX.
    base_loss = jnp.sum(ce_base) / jnp.float32(B)
    embedding_loss = jnp.sum(ce_emb) / jnp.float32(B)
    col = jnp.sum(colsum, axis=0).reshape(GE_pad)       # combine parallel slices
    gate_loss = jnp.float32(0.0)
    off = 0
    for w in gate_widths:                               # matrix 1-norm per gate
        gate_loss = gate_loss + jnp.max(col[off:off + w])
        off += w
    return base_loss + lambda_val * gate_loss + mu * embedding_loss


def _reference(outputs, embedding_outputs, targets, gates,
               lambda_val=0.001, mu=1.0):
    def ce(lg):
        lg = lg.astype(jnp.float32)
        lse = jax.nn.logsumexp(lg, axis=-1)
        picked = lg[jnp.arange(lg.shape[0]), targets]
        return jnp.mean(lse - picked)

    gate_loss = sum(jnp.max(jnp.sum(jnp.abs(g.astype(jnp.float32)), axis=0))
                    for g in gates)
    return ce(outputs) + lambda_val * gate_loss + mu * ce(embedding_outputs)


if __name__ == "__main__":
    key = jax.random.PRNGKey(0)
    k_out, k_emb, k_tgt, k_g0, k_g1, k_g2 = jax.random.split(key, 6)

    B, C, E, G = 8, 32, 16, 3    # batch, num classes, gate width, num gate layers

    outputs = jax.random.normal(k_out, (B, C), dtype=jnp.float32)
    embedding_outputs = jax.random.normal(k_emb, (B, C), dtype=jnp.float32)
    targets = jax.random.randint(k_tgt, (B,), 0, C, dtype=jnp.int32)
    gates = [
        jnp.abs(jax.random.normal(k, (B, E), dtype=jnp.float32))
        for k in (k_g0, k_g1, k_g2)
    ]

    total = deepmoe_loss(outputs, embedding_outputs, targets, gates,
                         lambda_val=0.001, mu=1.0)
    total = jax.block_until_ready(total)

    ref = _reference(outputs, embedding_outputs, targets, gates,
                     lambda_val=0.001, mu=1.0)
    assert jnp.allclose(total, ref, rtol=1e-5, atol=1e-5), (total, ref)

    print("KERNEL_OK")
</pallas_src>

<mosaic_0001>
module attributes {stable_mosaic.version = 11 : i64} {
  func.func @_deepmoe_loss_kernel(%arg0: i32, %arg1: i32, %arg2: memref<8x32xf32, #tpu.memory_space<vmem>>, %arg3: memref<8x32xf32, #tpu.memory_space<vmem>>, %arg4: memref<8x1xi32, #tpu.memory_space<vmem>>, %arg5: memref<8x128xf32, #tpu.memory_space<vmem>>, %arg6: memref<1x1x1xf32, #tpu.memory_space<vmem>>, %arg7: memref<1x1x1xf32, #tpu.memory_space<vmem>>, %arg8: memref<1x1x128xf32, #tpu.memory_space<vmem>>) attributes {dimension_semantics = [#tpu.dimension_semantics<parallel>, #tpu.dimension_semantics<arbitrary>], iteration_bounds = array<i64: 1, 1>, scalar_prefetch = 0 : i64, scratch_operands = 0 : i64, tpu.core_type = #tpu.core_type<tc>, window_params = [{transform_indices = @transform_0, window_bounds = array<i64: 8, 32>}, {transform_indices = @transform_1, window_bounds = array<i64: 8, 32>}, {transform_indices = @transform_2, window_bounds = array<i64: 8, 1>}, {transform_indices = @transform_3, window_bounds = array<i64: 8, 128>}, {transform_indices = @transform_4, window_bounds = array<i64: 1, 1, 1>}, {transform_indices = @transform_5, window_bounds = array<i64: 1, 1, 1>}, {transform_indices = @transform_6, window_bounds = array<i64: 1, 1, 128>}]} {
    %c0_i32 = arith.constant 0 : i32
    %0 = arith.cmpi eq, %arg1, %c0_i32 : i32
    %1 = arith.extui %0 : i1 to i32
    %c0_i32_0 = arith.constant 0 : i32
    %2 = arith.cmpi ne, %1, %c0_i32_0 : i32
    scf.if %2 {
      %cst_36 = arith.constant 0.000000e+00 : f32
      %61 = vector.broadcast %cst_36 : f32 to vector<1x1x1xf32>
      %c0_37 = arith.constant 0 : index
      %c0_38 = arith.constant 0 : index
      %c0_39 = arith.constant 0 : index
      %62 = vector.load %arg6[%c0_37, %c0_38, %c0_39] : memref<1x1x1xf32, #tpu.memory_space<vmem>>, vector<1x1x1xf32>
      tpu.vector_store %arg6[%c0_37, %c0_38, %c0_39], %61 {strides = array<i32>} : memref<1x1x1xf32, #tpu.memory_space<vmem>>, vector<1x1x1xf32>,
      %cst_40 = arith.constant 0.000000e+00 : f32
      %63 = vector.broadcast %cst_40 : f32 to vector<1x1x1xf32>
      %c0_41 = arith.constant 0 : index
      %c0_42 = arith.constant 0 : index
      %c0_43 = arith.constant 0 : index
      %64 = vector.load %arg7[%c0_41, %c0_42, %c0_43] : memref<1x1x1xf32, #tpu.memory_space<vmem>>, vector<1x1x1xf32>
      tpu.vector_store %arg7[%c0_41, %c0_42, %c0_43], %63 {strides = array<i32>} : memref<1x1x1xf32, #tpu.memory_space<vmem>>, vector<1x1x1xf32>,
      %cst_44 = arith.constant 0.000000e+00 : f32
      %65 = vector.broadcast %cst_44 : f32 to vector<1x1x128xf32>
      %c0_45 = arith.constant 0 : index
      %c0_46 = arith.constant 0 : index
      %c0_47 = arith.constant 0 : index
      %66 = vector.load %arg8[%c0_45, %c0_46, %c0_47] : memref<1x1x128xf32, #tpu.memory_space<vmem>>, vector<1x1x128xf32>
      tpu.vector_store %arg8[%c0_45, %c0_46, %c0_47], %65 {strides = array<i32>} : memref<1x1x128xf32, #tpu.memory_space<vmem>>, vector<1x1x128xf32>,
    } else {
    }
    %c0 = arith.constant 0 : index
    %c0_1 = arith.constant 0 : index
    %3 = vector.load %arg4[%c0, %c0_1] : memref<8x1xi32, #tpu.memory_space<vmem>>, vector<8x1xi32>
    %4 = tpu.iota {dimensions = array<i32: 1>} : vector<8x32xi32>
    %5 = vector.broadcast %3 : vector<8x1xi32> to vector<8x32xi32>
    %6 = arith.cmpi eq, %4, %5 : vector<8x32xi32>
    %c0_2 = arith.constant 0 : index
    %c0_3 = arith.constant 0 : index
    %7 = vector.load %arg2[%c0_2, %c0_3] : memref<8x32xf32, #tpu.memory_space<vmem>>, vector<8x32xf32>
    %c0_4 = arith.constant 0 : index
    %c0_5 = arith.constant 0 : index
    %8 = vector.load %arg3[%c0_4, %c0_5] : memref<8x32xf32, #tpu.memory_space<vmem>>, vector<8x32xf32>
    %c0_6 = arith.constant 0 : index
    %c0_7 = arith.constant 0 : index
    %c0_8 = arith.constant 0 : index
    %9 = vector.load %arg6[%c0_6, %c0_7, %c0_8] : memref<1x1x1xf32, #tpu.memory_space<vmem>>, vector<1x1x1xf32>
    %cst = arith.constant dense<0xFF800000> : vector<8xf32>
    %10 = vector.multi_reduction <maximumf>, %7, %cst [1] : vector<8x32xf32> to vector<8xf32>
    %11 = vector.shape_cast %10 : vector<8xf32> to vector<8x1xf32>
    %12 = vector.broadcast %11 : vector<8x1xf32> to vector<8x32xf32>
    %13 = arith.subf %7, %12 : vector<8x32xf32>
    %14 = math.exp %13 : vector<8x32xf32>
    %cst_9 = arith.constant dense<0.000000e+00> : vector<8xf32>
    %15 = vector.multi_reduction <add>, %14, %cst_9 [1] : vector<8x32xf32> to vector<8xf32>
    %16 = vector.shape_cast %15 : vector<8xf32> to vector<8x1xf32>
    %17 = math.log %16 : vector<8x1xf32>
    %18 = arith.addf %11, %17 : vector<8x1xf32>
    %cst_10 = arith.constant 0.000000e+00 : f32
    %19 = vector.broadcast %cst_10 : f32 to vector<8x32xf32>
    %20 = arith.select %6, %7, %19 : vector<8x32xi1>, vector<8x32xf32>
    %cst_11 = arith.constant dense<0.000000e+00> : vector<8xf32>
    %21 = vector.multi_reduction <add>, %20, %cst_11 [1] : vector<8x32xf32> to vector<8xf32>
    %22 = vector.shape_cast %21 : vector<8xf32> to vector<8x1xf32>
    %23 = arith.subf %18, %22 : vector<8x1xf32>
    %24 = vector.shape_cast %23 : vector<8x1xf32> to vector<1x8x1xf32>
    %cst_12 = arith.constant dense<0.000000e+00> : vector<1xf32>
    %25 = vector.multi_reduction <add>, %24, %cst_12 [1, 2] : vector<1x8x1xf32> to vector<1xf32>
    %26 = vector.shape_cast %25 : vector<1xf32> to vector<1x1x1xf32>
    %27 = vector.extract %26[0, 0, 0] : f32 from vector<1x1x1xf32>
    %28 = vector.broadcast %27 : f32 to vector<1x1x1xf32>
    %29 = arith.addf %9, %28 : vector<1x1x1xf32>
    %c0_13 = arith.constant 0 : index
    %c0_14 = arith.constant 0 : index
    %c0_15 = arith.constant 0 : index
    %30 = vector.load %arg6[%c0_13, %c0_14, %c0_15] : memref<1x1x1xf32, #tpu.memory_space<vmem>>, vector<1x1x1xf32>
    tpu.vector_store %arg6[%c0_13, %c0_14, %c0_15], %29 {strides = array<i32>} : memref<1x1x1xf32, #tpu.memory_space<vmem>>, vector<1x1x1xf32>,
    %c0_16 = arith.constant 0 : index
    %c0_17 = arith.constant 0 : index
    %c0_18 = arith.constant 0 : index
    %31 = vector.load %arg7[%c0_16, %c0_17, %c0_18] : memref<1x1x1xf32, #tpu.memory_space<vmem>>, vector<1x1x1xf32>
    %cst_19 = arith.constant dense<0xFF800000> : vector<8xf32>
    %32 = vector.multi_reduction <maximumf>, %8, %cst_19 [1] : vector<8x32xf32> to vector<8xf32>
    %33 = vector.shape_cast %32 : vector<8xf32> to vector<8x1xf32>
    %34 = vector.broadcast %33 : vector<8x1xf32> to vector<8x32xf32>
    %35 = arith.subf %8, %34 : vector<8x32xf32>
    %36 = math.exp %35 : vector<8x32xf32>
    %cst_20 = arith.constant dense<0.000000e+00> : vector<8xf32>
    %37 = vector.multi_reduction <add>, %36, %cst_20 [1] : vector<8x32xf32> to vector<8xf32>
    %38 = vector.shape_cast %37 : vector<8xf32> to vector<8x1xf32>
    %39 = math.log %38 : vector<8x1xf32>
    %40 = arith.addf %33, %39 : vector<8x1xf32>
    %cst_21 = arith.constant 0.000000e+00 : f32
    %41 = vector.broadcast %cst_21 : f32 to vector<8x32xf32>
    %42 = arith.select %6, %8, %41 : vector<8x32xi1>, vector<8x32xf32>
    %cst_22 = arith.constant dense<0.000000e+00> : vector<8xf32>
    %43 = vector.multi_reduction <add>, %42, %cst_22 [1] : vector<8x32xf32> to vector<8xf32>
    %44 = vector.shape_cast %43 : vector<8xf32> to vector<8x1xf32>
    %45 = arith.subf %40, %44 : vector<8x1xf32>
    %46 = vector.shape_cast %45 : vector<8x1xf32> to vector<1x8x1xf32>
    %cst_23 = arith.constant dense<0.000000e+00> : vector<1xf32>
    %47 = vector.multi_reduction <add>, %46, %cst_23 [1, 2] : vector<1x8x1xf32> to vector<1xf32>
    %48 = vector.shape_cast %47 : vector<1xf32> to vector<1x1x1xf32>
    %49 = vector.extract %48[0, 0, 0] : f32 from vector<1x1x1xf32>
    %50 = vector.broadcast %49 : f32 to vector<1x1x1xf32>
    %51 = arith.addf %31, %50 : vector<1x1x1xf32>
    %c0_24 = arith.constant 0 : index
    %c0_25 = arith.constant 0 : index
    %c0_26 = arith.constant 0 : index
    %52 = vector.load %arg7[%c0_24, %c0_25, %c0_26] : memref<1x1x1xf32, #tpu.memory_space<vmem>>, vector<1x1x1xf32>
    tpu.vector_store %arg7[%c0_24, %c0_25, %c0_26], %51 {strides = array<i32>} : memref<1x1x1xf32, #tpu.memory_space<vmem>>, vector<1x1x1xf32>,
    %c0_27 = arith.constant 0 : index
    %c0_28 = arith.constant 0 : index
    %53 = vector.load %arg5[%c0_27, %c0_28] : memref<8x128xf32, #tpu.memory_space<vmem>>, vector<8x128xf32>
    %c0_29 = arith.constant 0 : index
    %c0_30 = arith.constant 0 : index
    %c0_31 = arith.constant 0 : index
    %54 = vector.load %arg8[%c0_29, %c0_30, %c0_31] : memref<1x1x128xf32, #tpu.memory_space<vmem>>, vector<1x1x128xf32>
    %55 = math.absf %53 : vector<8x128xf32>
    %cst_32 = arith.constant dense<0.000000e+00> : vector<128xf32>
    %56 = vector.multi_reduction <add>, %55, %cst_32 [0] : vector<8x128xf32> to vector<128xf32>
    %57 = vector.shape_cast %56 : vector<128xf32> to vector<1x128xf32>
    %58 = vector.shape_cast %57 : vector<1x128xf32> to vector<1x1x128xf32>
    %59 = arith.addf %54, %58 : vector<1x1x128xf32>
    %c0_33 = arith.constant 0 : index
    %c0_34 = arith.constant 0 : index
    %c0_35 = arith.constant 0 : index
    %60 = vector.load %arg8[%c0_33, %c0_34, %c0_35] : memref<1x1x128xf32, #tpu.memory_space<vmem>>, vector<1x1x128xf32>
    tpu.vector_store %arg8[%c0_33, %c0_34, %c0_35], %59 {strides = array<i32>} : memref<1x1x128xf32, #tpu.memory_space<vmem>>, vector<1x1x128xf32>,
    return
  }
  func.func @transform_0(%arg0: i32, %arg1: i32) -> (i32, i32) {
    %c1_i32 = arith.constant 1 : i32
    %0 = arith.muli %arg0, %c1_i32 : i32
    %1 = arith.addi %0, %arg1 : i32
    %c0_i32 = arith.constant 0 : i32
    %c0_i32_0 = arith.constant 0 : i32
    return %1, %c0_i32 : i32, i32
  }
  func.func @transform_1(%arg0: i32, %arg1: i32) -> (i32, i32) {
    %c1_i32 = arith.constant 1 : i32
    %0 = arith.muli %arg0, %c1_i32 : i32
    %1 = arith.addi %0, %arg1 : i32
    %c0_i32 = arith.constant 0 : i32
    %c0_i32_0 = arith.constant 0 : i32
    return %1, %c0_i32 : i32, i32
  }
  func.func @transform_2(%arg0: i32, %arg1: i32) -> (i32, i32) {
    %c1_i32 = arith.constant 1 : i32
    %0 = arith.muli %arg0, %c1_i32 : i32
    %1 = arith.addi %0, %arg1 : i32
    %c0_i32 = arith.constant 0 : i32
    %c0_i32_0 = arith.constant 0 : i32
    return %1, %c0_i32 : i32, i32
  }
  func.func @transform_3(%arg0: i32, %arg1: i32) -> (i32, i32) {
    %c1_i32 = arith.constant 1 : i32
    %0 = arith.muli %arg0, %c1_i32 : i32
    %1 = arith.addi %0, %arg1 : i32
    %c0_i32 = arith.constant 0 : i32
    %c0_i32_0 = arith.constant 0 : i32
    return %1, %c0_i32 : i32, i32
  }
  func.func @transform_4(%arg0: i32, %arg1: i32) -> (i32, i32, i32) {
    %c0_i32 = arith.constant 0 : i32
    %c0_i32_0 = arith.constant 0 : i32
    %c0_i32_1 = arith.constant 0 : i32
    return %arg0, %c0_i32, %c0_i32_0 : i32, i32, i32
  }
  func.func @transform_5(%arg0: i32, %arg1: i32) -> (i32, i32, i32) {
    %c0_i32 = arith.constant 0 : i32
    %c0_i32_0 = arith.constant 0 : i32
    %c0_i32_1 = arith.constant 0 : i32
    return %arg0, %c0_i32, %c0_i32_0 : i32, i32, i32
  }
  func.func @transform_6(%arg0: i32, %arg1: i32) -> (i32, i32, i32) {
    %c0_i32 = arith.constant 0 : i32
    %c0_i32_0 = arith.constant 0 : i32
    %c0_i32_1 = arith.constant 0 : i32
    return %arg0, %c0_i32, %c0_i32_0 : i32, i32, i32
  }
}

</mosaic_0001>

<bundles_post_ra>
// kernel: tpu_custom_call.1
= control target key start
LH: loop header
LB: loop body
LE: loop exit
PB: predicated region body
PF: predicated region fallthrough
CT: control target
= control target key end

     0   :  { %12 = vsyncpa [#allocation3], 0  ;;  %s438_s0 = inlined_call_operand.vmem [shape: f32[8,32], index: 0, kind: input, shape index: {}]   ;;  %s439_s1 = inlined_call_operand.hbm [shape: f32[8,32], index: 1, kind: input, shape index: {}]   ;;  %s440_s2 = inlined_call_operand.vmem [shape: s32[8,1], index: 2, kind: input, shape index: {}]   ;;  %s441_s3 = inlined_call_operand.hbm [shape: f32[8,128], index: 3, kind: input, shape index: {}]   ;;  %s442_s4 = inlined_call_operand.hbm [shape: f32[1,1,1], index: 4, kind: output, shape index: {0}]   ;;  %s443_s5 = inlined_call_operand.hbm [shape: f32[1,1,1], index: 5, kind: output, shape index: {1}]   ;;  %s444_s6 = inlined_call_operand.hbm [shape: f32[1,1,128], index: 6, kind: output, shape index: {2}]  }
   0x1   :  { %13 = vsyncpa [#allocation6], 0 }
   0x2   :  { %14 = vsyncpa [#allocation4], 0 }
   0x3   :  { %15 = vsyncpa [#allocation9], 0  ;;  %s365_s21 = smov [#allocation2]   ;;  %s366_s23 = smov [#allocation5]  }
   0x4   :  { %s33_s22 = sshll.u32 %s365_s21, 4  ;;  %s54_s24 = sshll.u32 %s366_s23, 4  ;;  %s34_s22 = int_to_ptr.vmem [resolvable:$true] %s33_s22  ;;  %s55_s24 = int_to_ptr.vmem [resolvable:$true] %s54_s24 }
   0x5   :  { %s265_s25 = scalar_lea.vmem %s34_s22, 128  ;;  %p270_p1 = scmp.lt.s32.totalorder %s34_s22, %s34_s22 }
   0x6   :  { %p266_p0 = scmp.ne.s32.totalorder %s34_s22, %s265_s25  ;;  %p271_p2 = scmp.lt.s32.totalorder %s265_s25, %s265_s25 }
   0x8   :  { %p272_p3 = por %p271_p2, %p270_p1 }
   0xa   :  { %p273_p4 = pnand %p272_p3, %p266_p0 }
   0xc   :  { %276 = shalt.err (!%p273_p4)
}
   0xd   :  { %36 = dma.hbm_to_vmem [thread:$0]  %s439_s1, 128, %s34_s22, [#allocation3]  }
   0xe   :  { %s285_s28 = scalar_lea.vmem %s55_s24, 128  ;;  %p290_p6 = scmp.lt.s32.totalorder %s55_s24, %s55_s24 }
   0xf   :  { %p286_p5 = scmp.ne.s32.totalorder %s55_s24, %s285_s28  ;;  %p291_p7 = scmp.lt.s32.totalorder %s285_s28, %s285_s28 }
  0x11   :  { %p292_p8 = por %p291_p7, %p290_p6 }
  0x13   :  { %p293_p9 = pnand %p292_p8, %p286_p5 }
  0x15   :  { %296 = shalt.err (!%p293_p9)
}
  0x16   :  { %57 = dma.hbm_to_vmem [thread:$0]  %s441_s3, 128, %s55_s24, [#allocation6]  }
  0x17   :  { %357 = dma.done.wait [#allocation3], 128  }
  0x18   :  { %358 = vsyncadd [#allocation3], 4294967168 }
  0x19   :  { %359 = dma.done.wait [#allocation6], 128  }
  0x1a   :  { %360 = vsyncadd [#allocation6], 4294967168  ;;  %v367_v0 = vmov 0   ;;  %vm106_vm0 = vcmask 261120   ;;  %v103_v1 = vld [vmem:[%s438_s0] sm:$0xff]  ;;  %v97_v12 = vlaneseq  ;;  %vm124_vm2 = vcmask 7168  }
  0x1b   :  { %247 = vset.pattern.permute.xlu1 %v367_v0  ;;  %248 = vset.pattern.permute.xlu0 %v367_v0  ;;  %v104_v2 = vld [vmem:[#allocation2] sm:$0xff]  ;;  %v107_v4 = vsel %vm106_vm0, %v103_v1, -inf  ;;  %vm92_vm3 = vcmask 0   ;;  %v368_v37 = vmov 0.0   ;;  %v170_v38 = vld [vmem:[#allocation5] sm:$0xff]  ;;  %s369_s0 = smov [#allocation7]  }
  0x1c   :  { %v96_v3 = vld [vmem:[%s440_s2] sm:$0xff]  ;;  %108 = vmax.xlane.f32.xlu0 %v107_v4  ;;  %v140_v5 = vsel %vm106_vm0, %v104_v2, -inf  ;;  %v98_v13 = vand.u32 127, %v97_v12  ;;  %93 = vst.msk [vmem:[#allocation7] sm:$0x1] %vm92_vm3, %v368_v37  ;;  %s187_s2 = sshll.u32 %s369_s0, 4  ;;  %s188_s2 = int_to_ptr.vmem [resolvable:$true] %s187_s2 }
  0x1d   :  { %100 = vperm.xlu1 %247, %v96_v3   ;;  %94 = vst.msk [vmem:[#allocation8] sm:$0x1] %vm92_vm3, %v368_v37  ;;  %95 = vst [vmem:[#allocation10] sm:$0x1] %v368_v37  ;;  %v172_v39 = vand.u32 2147483647, %v170_v38  ;;  %p302_p11 = scmp.lt.s32.totalorder %s188_s2, %s188_s2 }
  0x1e   :  { %s370_s10 = smov [#allocation8]   ;;  %s371_s13 = smov [#allocation10]  }
  0x1f   :  { %v173_v40 = vrot.slane %v172_v39, 4  ;;  %s197_s11 = sshll.u32 %s370_s10, 4  ;;  %s207_s14 = sshll.u32 %s371_s13, 4  ;;  %s198_s11 = int_to_ptr.vmem [resolvable:$true] %s197_s11  ;;  %s208_s14 = int_to_ptr.vmem [resolvable:$true] %s207_s14 }
  0x20   :  { %141 = vmax.xlane.f32.xlu0 %v140_v5  ;;  %s297_s15 = scalar_lea.vmem %s188_s2, 16  ;;  %s301_s16 = scalar_lea.vmem %s188_s2, 32 }
  0x21   :  { %v174_v41 = vadd.f32 %v173_v40, %v172_v39  ;;  %p298_p10 = scmp.ne.s32.totalorder %s188_s2, %s297_s15  ;;  %p303_p12 = scmp.lt.s32.totalorder %s301_s16, %s297_s15 }
  0x23   :  { %v175_v42 = vrot.slane %v174_v41, 2  ;;  %v105_v62 = vld [vmem:[#allocation7] sm:$0x1]  ;;  %p304_p13 = por %p303_p12, %p302_p11 }
  0x24   :  { %v171_v46 = vld [vmem:[#allocation10] sm:$0x1] }
  0x25   :  { %v176_v43 = vadd.f32 %v175_v42, %v174_v41  ;;  %p305_p0 = pnand %p304_p13, %p298_p10 }
  0x27   :  { %v177_v44 = vrot.slane %v176_v43, 1 }
  0x29   :  { %v178_v45 = vadd.f32 %v177_v44, %v176_v43 }
  0x2b   :  { %v179_v47 = vadd.f32 %v178_v45, %v171_v46 }
  0x2d   :  { %180 = vst [vmem:[#allocation10] sm:$0x1] %v179_v47 }
  0x98   :  { %v101_v14 = vpop.permute.xlu1 %100 }
  0x99   :  { %vm102_vm1 = vcmp.eq.s32.totalorder %v98_v13, %v101_v14 }
  0x9a   :  { %v119_v18 = vsel %vm102_vm1, %v103_v1, 0.0  ;;  %v152_v21 = vsel %vm102_vm1, %v104_v2, 0.0 }
  0x9b   :  { %v120_v20 = vsel %vm106_vm0, %v119_v18, 0.0  ;;  %v153_v22 = vsel %vm106_vm0, %v152_v21, 0.0 }
  0xa5   :  { %v109_v6 = vpop.xlane.xlu0 %108 }
  0xa6   :  { %v110_v7 = vsub.f32 %v103_v1, %v109_v6  ;;  %v139_v1 = vld [vmem:[#allocation8] sm:$0x1] }
  0xa8   :  { %v111_v8 = vmul.f32 1.442695, %v110_v7 }
  0xa9   :  { %v142_v9 = vpop.xlane.xlu0 %141 }
  0xaa   :  { %249 = vpow2.f32 %v111_v8  ;;  %v143_v10 = vsub.f32 %v104_v2, %v142_v9 }
  0xac   :  { %v144_v11 = vmul.f32 1.442695, %v143_v10 }
  0xae   :  { %251 = vpow2.f32 %v144_v11 }
  0xb7   :  { %v250_v15 = vpop.eup %249 }
  0xb8   :  { %v113_v16 = vsel %vm106_vm0, %v250_v15, 0.0 }
  0xb9   :  { %114 = vadd.xlane.f32.xlu1 %v113_v16 }
  0xbb   :  { %v252_v17 = vpop.eup %251 }
  0xbc   :  { %v146_v19 = vsel %vm106_vm0, %v252_v17, 0.0 }
  0xbd   :  { %147 = vadd.xlane.f32.xlu0 %v146_v19 }
  0xc1   :  { %121 = vadd.xlane.f32.xlu0 %v120_v20 }
  0xc5   :  { %154 = vadd.xlane.f32.xlu0 %v153_v22 }
 0x142   :  { %v115_v23 = vpop.xlane.xlu1 %114 }
 0x143   :  { %253 = vlog2.f32 %v115_v23 }
 0x146   :  { %v148_v24 = vpop.xlane.xlu0 %147 }
 0x147   :  { %255 = vlog2.f32 %v148_v24 }
 0x14a   :  { %v122_v27 = vpop.xlane.xlu0 %121 }
 0x14e   :  { %v155_v34 = vpop.xlane.xlu0 %154 }
 0x150   :  { %v254_v25 = vpop.eup %253 }
 0x151   :  { %v117_v26 = vmul.f32 0.6931472, %v254_v25 }
 0x153   :  { %v118_v28 = vadd.f32 %v117_v26, %v109_v6 }
 0x154   :  { %v256_v29 = vpop.eup %255 }
 0x155   :  { %v150_v30 = vmul.f32 0.6931472, %v256_v29  ;;  %v123_v31 = vsub.f32 %v118_v28, %v122_v27 }
 0x157   :  { %v151_v32 = vadd.f32 %v150_v30, %v142_v9  ;;  %v125_v33 = vsel %vm124_vm2, %v123_v31, 0.0 }
 0x158   :  { %126 = vadd.xlane.f32.xlu0 %v125_v33 }
 0x159   :  { %v156_v35 = vsub.f32 %v151_v32, %v155_v34 }
 0x15b   :  { %v157_v36 = vsel %vm124_vm2, %v156_v35, 0.0 }
 0x15c   :  { %158 = vadd.xlane.f32.xlu0 %v157_v36 }
 0x1e1   :  { %v127_v48 = vpop.xlane.xlu0 %126 }
 0x1e2   :  { %v128_v49 = vrot.slane %v127_v48, 4 }
 0x1e4   :  { %v129_v50 = vadd.f32 %v128_v49, %v127_v48 }
 0x1e5   :  { %v159_v51 = vpop.xlane.xlu0 %158 }
 0x1e6   :  { %v130_v52 = vrot.slane %v129_v50, 2  ;;  %v160_v53 = vrot.slane %v159_v51, 4 }
 0x1e8   :  { %v161_v54 = vadd.f32 %v160_v53, %v159_v51  ;;  %v131_v55 = vadd.f32 %v130_v52, %v129_v50 }
 0x1ea   :  { %v162_v56 = vrot.slane %v161_v54, 2  ;;  %v132_v57 = vrot.slane %v131_v55, 1 }
 0x1ec   :  { %v163_v58 = vadd.f32 %v162_v56, %v161_v54  ;;  %v133_v59 = vadd.f32 %v132_v57, %v131_v55 }
 0x1ee   :  { %236 = vpush %v133_v59  ;;  %v164_v60 = vrot.slane %v163_v58, 1 }
 0x1f0   :  { %v165_v61 = vadd.f32 %v164_v60, %v163_v58 }
 0x1f2   :  { %238 = vpush %v165_v61 }
 0x21f   :  { %s237_s3 = spop %236 }
 0x220   :  { %v135_v63 = vstv %s237_s3 }
 0x221   :  { %v136_v0 = vadd.f32 %v135_v63, %v105_v62 }
 0x223   :  { %138 = vst.msk [vmem:[#allocation7] sm:$0x1] %vm92_vm3, %v136_v0  ;;  %s239_s12 = spop %238 }
 0x224   :  { %v167_v2 = vstv %s239_s12 }
 0x225   :  { %308 = shalt.err (!%p305_p0)
}
 0x226   :  { %190 = dma.vmem_to_hbm [thread:$0]  %s188_s2, 16, %s442_s4, [#allocation4]   ;;  %v168_v3 = vadd.f32 %v167_v2, %v139_v1 }
 0x227   :  { %s317_s19 = scalar_lea.vmem %s198_s11, 16  ;;  %s321_s20 = scalar_lea.vmem %s198_s11, 32 }
 0x228   :  { %169 = vst.msk [vmem:[#allocation8] sm:$0x1] %vm92_vm3, %v168_v3  ;;  %p318_p1 = scmp.ne.s32.totalorder %s198_s11, %s317_s19  ;;  %p322_p2 = scmp.lt.s32.totalorder %s198_s11, %s198_s11 }
 0x229   :  { %p323_p3 = scmp.lt.s32.totalorder %s321_s20, %s317_s19 }
 0x22b   :  { %p324_p4 = por %p323_p3, %p322_p2 }
 0x22d   :  { %p325_p5 = pnand %p324_p4, %p318_p1 }
 0x22f   :  { %328 = shalt.err (!%p325_p5)
}
 0x230   :  { %200 = dma.vmem_to_hbm [thread:$0]  %s198_s11, 16, %s443_s5, [#allocation9]  }
 0x231   :  { %s337_s23 = scalar_lea.vmem %s208_s14, 16  ;;  %s341_s4 = scalar_lea.vmem %s208_s14, 32 }
 0x232   :  { %p338_p6 = scmp.ne.s32.totalorder %s208_s14, %s337_s23  ;;  %p342_p7 = scmp.lt.s32.totalorder %s208_s14, %s208_s14 }
 0x233   :  { %p343_p8 = scmp.lt.s32.totalorder %s341_s4, %s337_s23 }
 0x235   :  { %p344_p9 = por %p343_p8, %p342_p7 }
 0x237   :  { %p345_p10 = pnand %p344_p9, %p338_p6 }
 0x239   :  { %348 = shalt.err (!%p345_p10)
}
 0x23a   :  { %210 = dma.vmem_to_hbm [thread:$0]  %s208_s14, 16, %s444_s6, [#allocation9]  }
 0x23b   :  { %361 = dma.done.wait [#allocation4], 16  }
 0x23c   :  { %362 = vsyncadd [#allocation4], 4294967280 }
 0x23d   :  { %363 = dma.done.wait [#allocation9], 32  }
 0x23e   :  { %364 = vsyncadd [#allocation9], 4294967264 }
 0x23f   :  { %220 = vsyncpa [#allocation3], 1 }
 0x240   :  { %221 = vsyncpa [#allocation6], 1 }
 0x241   :  { %222 = vsyncpa [#allocation4], 1 }
 0x242   :  { %223 = vsyncpa [#allocation9], 1 }

</bundles_post_ra>
